<compile_context>
chip_gen: v7x
topology: tpu7x:2x2x1
jax: 0.10.0
libtpu: 0.0.40
codegen_flags: <defaults>
</compile_context>

<pallas_src>
import functools

import jax
import jax.numpy as jnp
from jax.experimental import pallas as pl
from jax.experimental.pallas import tpu as pltpu

BN_EPS = 1e-5


def _vmem_limit_bytes(default=32 * 1024 * 1024):
    """Generation-aware scoped-VMEM limit (v5e/v6e: 128 MiB phys, v7x: 64 MiB)."""
    try:
        info = pltpu.get_tpu_info()
        cap = getattr(info, "vmem_capacity_bytes", None)
        if cap:
            return int(min(cap * 3 // 4, 96 * 1024 * 1024))
    except Exception:
        pass
    return default


def _pick_tile(extent, max_size, quantum):
    """Largest divisor of `extent` <= max_size that is a multiple of `quantum`
    (falls back to any divisor, then to the full extent)."""
    max_size = max(int(max_size), 1)
    divs = [t for t in range(1, extent + 1) if extent % t == 0 and t <= max_size]
    pref = [t for t in divs if t % quantum == 0]
    if pref:
        return max(pref)
    if divs:
        return max(divs)
    return extent


# ---------------------------------------------------------------------------
# Kernel 1: KH-fused conv matmul + per-tile partial BatchNorm statistics.
# ---------------------------------------------------------------------------
def _conv_stats_kernel(x_ref, w_ref, y_ref, stats_ref):
    """
    x_ref:     (TM, K)   compute_dtype  im2col rows, K = KH*Wp*Cin
    w_ref:     (K, TWC)  compute_dtype  KH-fused banded conv weights
    y_ref:     (TM, TWC) compute_dtype  conv output tile (lane-dense)
    stats_ref: (2, TWC)  f32            per-tile per-lane [sum ; centered M2]
    """
    acc = jnp.dot(x_ref[...], w_ref[...], preferred_element_type=jnp.float32)
    y_ref[...] = acc.astype(y_ref.dtype)
    rows = acc.shape[0]
    s = jnp.sum(acc, axis=0, keepdims=True)
    mu = s * (1.0 / rows)
    d = acc - mu
    m2 = jnp.sum(d * d, axis=0, keepdims=True)
    stats_ref[...] = jnp.concatenate([s, m2], axis=0)   # single (2, TWC) store


# ---------------------------------------------------------------------------
# Kernel 2: apply BN (precomputed per-channel scale/shift) + ReLU.
# ---------------------------------------------------------------------------
def _bn_relu_kernel(y_ref, scale_ref, shift_ref, o_ref):
    """y_ref: (TM2, TWC) compute_dtype; scale/shift: (1, TWC) f32; o: f32."""
    y = y_ref[...].astype(jnp.float32)
    o_ref[...] = jnp.maximum(y * scale_ref[...] + shift_ref[...], 0.0)


def _banded_weights(conv_w, out_w, kh, kw, pad_w, dtype):
    """OIHW conv weights -> (KH*Wp*Cin, W*Cout) banded matrix so the 3x3 conv
    becomes one plain matmul on (rows, KH*Wp*Cin) tiles (K ordering: dh, wi, ci
    matches the wrapper's lane-axis concat of shifted padded rows)."""
    c_out, c_in = conv_w.shape[0], conv_w.shape[1]
    wp = out_w + 2 * pad_w
    w_hwio = jnp.transpose(conv_w, (2, 3, 1, 0)).astype(jnp.float32)  # (KH,KW,Cin,Cout)
    w_in_i = jnp.arange(wp)[:, None, None]
    dw_i = jnp.arange(kw)[None, :, None]
    w_out_i = jnp.arange(out_w)[None, None, :]
    sel = (w_in_i == w_out_i + dw_i).astype(jnp.float32)              # (Wp, KW, W)
    band = jnp.einsum("idw,kdco->kicwo", sel, w_hwio)                 # (KH,Wp,Cin,W,Cout)
    return band.reshape(kh * wp * c_in, out_w * c_out).astype(dtype)


@functools.partial(
    jax.jit, static_argnames=("kernel_size", "stride", "padding", "compute_dtype"))
def conv_block_forward(x_nchw, conv_w, conv_b, bn_gamma, bn_beta,
                       kernel_size=(3, 3), stride=(1, 1), padding=(1, 1),
                       compute_dtype=jnp.bfloat16):
    """Forward pass of ConvBlock. x_nchw: (N, Cin, H, W) f32 -> (N, Cout, H, W) f32."""
    del conv_b  # exactly cancelled by training-mode BN mean subtraction
    n, c_in, h, w = x_nchw.shape
    kh, kw = kernel_size
    c_out = conv_w.shape[0]
    if tuple(stride) != (1, 1) or tuple(padding) != (kh // 2, kw // 2):
        # TODO(synk): general stride / padding needs a different row/col mapping.
        raise ValueError("fused kernel implements the ConvBlock defaults: "
                         "stride 1, 'same' padding")

    wp = w + 2 * (kw // 2)
    k_dim = kh * wp * c_in          # fused contraction depth (216 at demo shapes)
    wc = w * c_out                  # lane-dense output width (128 at demo shapes)
    m_rows = n * h                  # batch folded into the matmul M axis
    dt = jnp.dtype(compute_dtype)

    vmem_limit = _vmem_limit_bytes()
    blk_budget = min(vmem_limit // 2, 32 * 1024 * 1024)

    # Column tile over W*Cout: bounds the resident weight band (v7x 64 MiB VMEM).
    twc = wc if wc <= 128 else _pick_tile(wc, 2048, 128)
    wcb = wc // twc

    # Row tiles derived from the VMEM budget (blocks are double-buffered).
    w_blk_bytes = 2 * k_dim * twc * dt.itemsize
    row_bytes1 = 2 * (k_dim + twc) * dt.itemsize + 64
    tm = _pick_tile(m_rows, min(max(8, (blk_budget - w_blk_bytes) // row_bytes1), 1024), 8)
    mb = m_rows // tm

    row_bytes2 = 2 * twc * (dt.itemsize + 4) + 64
    tm2 = _pick_tile(m_rows, min(max(8, blk_budget // row_bytes2), 2048), 8)
    mb2 = m_rows // tm2

    # ---- layout prep: cast first (halves prep bytes), pad, KH-shifted slices
    #      concatenated on the lane axis -> (N*H, KH*Wp*Cin) im2col-over-H only.
    x_nhwc = jnp.transpose(x_nchw.astype(compute_dtype), (0, 2, 3, 1))
    x_pad = jnp.pad(x_nhwc, ((0, 0), (kh // 2, kh // 2), (kw // 2, kw // 2), (0, 0)))
    x_pad = x_pad.reshape(n, h + kh - 1, wp * c_in)
    cols = jnp.concatenate([x_pad[:, dh:dh + h, :] for dh in range(kh)], axis=-1)
    cols = cols.reshape(m_rows, k_dim)

    w_band = _banded_weights(conv_w, w, kh, kw, kw // 2, compute_dtype)  # (K, WC)

    # ---- pass 1: fused conv matmul + per-tile partial stats ------------------
    y, stats = pl.pallas_call(
        _conv_stats_kernel,
        out_shape=(jax.ShapeDtypeStruct((m_rows, wc), compute_dtype),
                   jax.ShapeDtypeStruct((mb, 2, wc), jnp.float32)),
        grid=(mb, wcb),
        in_specs=[
            pl.BlockSpec((tm, k_dim), lambda i, j: (i, 0)),
            pl.BlockSpec((k_dim, twc), lambda i, j: (0, j)),
        ],
        out_specs=[
            pl.BlockSpec((tm, twc), lambda i, j: (i, j)),
            pl.BlockSpec((None, 2, twc), lambda i, j: (i, 0, j)),
        ],
        compiler_params=pltpu.CompilerParams(
            dimension_semantics=("parallel", "parallel"),
            vmem_limit_bytes=vmem_limit),
    )(cols, w_band)

    # ---- combine partial stats (numerically-safe group merge, tiny JAX op) ---
    part = stats.reshape(mb, 2, w, c_out)
    g_sum = part[:, 0].reshape(-1, c_out)        # (mb*W, Cout), groups of `tm`
    g_m2 = part[:, 1].reshape(-1, c_out)
    cnt = float(tm)
    total = float(m_rows * w)                    # = N*H*W
    mean = jnp.sum(g_sum, axis=0) / total
    g_mean = g_sum / cnt
    var = (jnp.sum(g_m2, axis=0)
           + cnt * jnp.sum((g_mean - mean) ** 2, axis=0)) / total
    inv_std = jax.lax.rsqrt(var + BN_EPS)
    scale_c = bn_gamma.astype(jnp.float32) * inv_std
    shift_c = bn_beta.astype(jnp.float32) - mean * scale_c
    scale_v = jnp.tile(scale_c, w).reshape(1, wc)   # per-channel, tiled over W
    shift_v = jnp.tile(shift_c, w).reshape(1, wc)

    # ---- pass 2: y * scale + shift, ReLU (independent, larger lane-dense tiles)
    out_flat = pl.pallas_call(
        _bn_relu_kernel,
        out_shape=jax.ShapeDtypeStruct((m_rows, wc), jnp.float32),
        grid=(mb2, wcb),
        in_specs=[
            pl.BlockSpec((tm2, twc), lambda i, j: (i, j)),
            pl.BlockSpec((1, twc), lambda i, j: (0, j)),
            pl.BlockSpec((1, twc), lambda i, j: (0, j)),
        ],
        out_specs=pl.BlockSpec((tm2, twc), lambda i, j: (i, j)),
        compiler_params=pltpu.CompilerParams(
            dimension_semantics=("parallel", "parallel"),
            vmem_limit_bytes=vmem_limit),
    )(y, scale_v, shift_v)

    # TODO(synk): fold this relayout into pass 2 / expose NHWC to avoid one more
    # HBM round trip of the output; module interface is NCHW, so keep it here.
    out_nhwc = out_flat.reshape(n, h, w, c_out)
    return jnp.transpose(out_nhwc, (0, 3, 1, 2))


def _reference(x_nchw, conv_w, conv_b, bn_gamma, bn_beta):
    """Pure-JAX reference (includes conv bias, which batch-stat BN cancels)."""
    y = jax.lax.conv_general_dilated(
        x_nchw, conv_w, window_strides=(1, 1), padding=((1, 1), (1, 1)),
        dimension_numbers=("NCHW", "OIHW", "NCHW"))
    y = y + conv_b[None, :, None, None]
    mean = jnp.mean(y, axis=(0, 2, 3), keepdims=True)
    var = jnp.mean((y - mean) ** 2, axis=(0, 2, 3), keepdims=True)
    y = (y - mean) * jax.lax.rsqrt(var + BN_EPS)
    y = y * bn_gamma[None, :, None, None] + bn_beta[None, :, None, None]
    return jnp.maximum(y, 0.0)


if __name__ == "__main__":
    # Small shapes consistent with the module: ConvBlock(in_planes=4, out_planes=8)
    N, C_IN, H, W = 2, 4, 16, 16
    C_OUT, KH, KW = 8, 3, 3

    key = jax.random.PRNGKey(0)
    k_x, k_w, k_b, k_g, k_beta = jax.random.split(key, 5)

    x = jax.random.normal(k_x, (N, C_IN, H, W), dtype=jnp.float32)
    fan_in = C_IN * KH * KW
    conv_w = jax.random.uniform(k_w, (C_OUT, C_IN, KH, KW), jnp.float32,
                                minval=-1.0, maxval=1.0) / (fan_in ** 0.5)
    conv_b = jax.random.uniform(k_b, (C_OUT,), jnp.float32,
                                minval=-1.0, maxval=1.0) / (fan_in ** 0.5)
    bn_gamma = 1.0 + 0.1 * jax.random.normal(k_g, (C_OUT,), jnp.float32)
    bn_beta = 0.1 * jax.random.normal(k_beta, (C_OUT,), jnp.float32)

    ref = _reference(x, conv_w, conv_b, bn_gamma, bn_beta)

    # f32 streaming path: matches the XLA reference tightly.
    out_f32 = jax.block_until_ready(
        conv_block_forward(x, conv_w, conv_b, bn_gamma, bn_beta,
                           compute_dtype=jnp.float32))
    assert out_f32.shape == (N, C_OUT, H, W)
    assert jnp.allclose(out_f32, ref, atol=1e-3, rtol=1e-3), "f32 mismatch vs reference"

    # bf16 streaming path (perf default): bf16 LHS/weights and bf16 intermediate
    # y quantize activations before/after the conv, hence looser tolerance —
    # an accuracy/perf trade, not a bug.
    out_bf16 = jax.block_until_ready(
        conv_block_forward(x, conv_w, conv_b, bn_gamma, bn_beta,
                           compute_dtype=jnp.bfloat16))
    assert jnp.allclose(out_bf16, ref, atol=3e-2, rtol=3e-2), "bf16 mismatch vs reference"

    print("KERNEL_OK")
</pallas_src>

<mosaic_0001>
module attributes {stable_mosaic.version = 11 : i64} {
  func.func @_conv_stats_kernel(%arg0: i32, %arg1: i32, %arg2: memref<32x216xf32, #tpu.memory_space<vmem>>, %arg3: memref<216x128xf32, #tpu.memory_space<vmem>>, %arg4: memref<32x128xf32, #tpu.memory_space<vmem>>, %arg5: memref<1x2x128xf32, #tpu.memory_space<vmem>>) attributes {dimension_semantics = [#tpu.dimension_semantics<parallel>, #tpu.dimension_semantics<parallel>], iteration_bounds = array<i64: 1, 1>, scalar_prefetch = 0 : i64, scratch_operands = 0 : i64, tpu.core_type = #tpu.core_type<tc>, window_params = [{transform_indices = @transform_0, window_bounds = array<i64: 32, 216>}, {transform_indices = @transform_1, window_bounds = array<i64: 216, 128>}, {transform_indices = @transform_2, window_bounds = array<i64: 32, 128>}, {transform_indices = @transform_3, window_bounds = array<i64: 1, 2, 128>}]} {
    %c0 = arith.constant 0 : index
    %c0_0 = arith.constant 0 : index
    %0 = vector.load %arg2[%c0, %c0_0] : memref<32x216xf32, #tpu.memory_space<vmem>>, vector<32x216xf32>
    %c0_1 = arith.constant 0 : index
    %c0_2 = arith.constant 0 : index
    %1 = vector.load %arg3[%c0_1, %c0_2] : memref<216x128xf32, #tpu.memory_space<vmem>>, vector<216x128xf32>
    %cst = arith.constant dense<0.000000e+00> : vector<32x128xf32>
    %2 = tpu.matmul %0, %1, %cst {dimension_numbers = #tpu.dot_dimension_numbers<[1], [0], [0], [1], [0, 0, 1, 1], [], []>} : vector<32x216xf32>, vector<216x128xf32>, vector<32x128xf32> -> vector<32x128xf32>
    %c0_3 = arith.constant 0 : index
    %c0_4 = arith.constant 0 : index
    %3 = vector.load %arg4[%c0_3, %c0_4] : memref<32x128xf32, #tpu.memory_space<vmem>>, vector<32x128xf32>
    tpu.vector_store %arg4[%c0_3, %c0_4], %2 {strides = array<i32>} : memref<32x128xf32, #tpu.memory_space<vmem>>, vector<32x128xf32>,
    %cst_5 = arith.constant dense<0.000000e+00> : vector<128xf32>
    %4 = vector.multi_reduction <add>, %2, %cst_5 [0] : vector<32x128xf32> to vector<128xf32>
    %5 = vector.shape_cast %4 : vector<128xf32> to vector<1x128xf32>
    %cst_6 = arith.constant 3.125000e-02 : f32
    %6 = vector.broadcast %cst_6 : f32 to vector<1x128xf32>
    %7 = arith.mulf %5, %6 : vector<1x128xf32>
    %8 = vector.broadcast %7 : vector<1x128xf32> to vector<32x128xf32>
    %9 = arith.subf %2, %8 : vector<32x128xf32>
    %10 = arith.mulf %9, %9 : vector<32x128xf32>
    %cst_7 = arith.constant dense<0.000000e+00> : vector<128xf32>
    %11 = vector.multi_reduction <add>, %10, %cst_7 [0] : vector<32x128xf32> to vector<128xf32>
    %12 = vector.shape_cast %11 : vector<128xf32> to vector<1x128xf32>
    %13 = tpu.concatenate %5, %12 in 0 : vector<1x128xf32>, vector<1x128xf32> -> vector<2x128xf32>
    %c0_8 = arith.constant 0 : index
    %c0_9 = arith.constant 0 : index
    %c0_10 = arith.constant 0 : index
    %14 = vector.load %arg5[%c0_8, %c0_9, %c0_10] : memref<1x2x128xf32, #tpu.memory_space<vmem>>, vector<1x2x128xf32>
    %15 = vector.shape_cast %14 : vector<1x2x128xf32> to vector<2x128xf32>
    %16 = vector.shape_cast %13 : vector<2x128xf32> to vector<1x2x128xf32>
    tpu.vector_store %arg5[%c0_8, %c0_9, %c0_10], %16 {strides = array<i32>} : memref<1x2x128xf32, #tpu.memory_space<vmem>>, vector<1x2x128xf32>,
    return
  }
  func.func @transform_0(%arg0: i32, %arg1: i32) -> (i32, i32) {
    %c0_i32 = arith.constant 0 : i32
    %c0_i32_0 = arith.constant 0 : i32
    return %arg0, %c0_i32 : i32, i32
  }
  func.func @transform_1(%arg0: i32, %arg1: i32) -> (i32, i32) {
    %c0_i32 = arith.constant 0 : i32
    %c0_i32_0 = arith.constant 0 : i32
    return %c0_i32, %arg1 : i32, i32
  }
  func.func @transform_2(%arg0: i32, %arg1: i32) -> (i32, i32) {
    %c0_i32 = arith.constant 0 : i32
    return %arg0, %arg1 : i32, i32
  }
  func.func @transform_3(%arg0: i32, %arg1: i32) -> (i32, i32, i32) {
    %c0_i32 = arith.constant 0 : i32
    %c0_i32_0 = arith.constant 0 : i32
    return %arg0, %c0_i32, %arg1 : i32, i32, i32
  }
}

module attributes {stable_mosaic.version = 11 : i64} {
  func.func @_bn_relu_kernel(%arg0: i32, %arg1: i32, %arg2: memref<32x128xf32, #tpu.memory_space<vmem>>, %arg3: memref<1x128xf32, #tpu.memory_space<vmem>>, %arg4: memref<1x128xf32, #tpu.memory_space<vmem>>, %arg5: memref<32x128xf32, #tpu.memory_space<vmem>>) attributes {dimension_semantics = [#tpu.dimension_semantics<parallel>, #tpu.dimension_semantics<parallel>], iteration_bounds = array<i64: 1, 1>, scalar_prefetch = 0 : i64, scratch_operands = 0 : i64, tpu.core_type = #tpu.core_type<tc>, window_params = [{transform_indices = @transform_0, window_bounds = array<i64: 32, 128>}, {transform_indices = @transform_1, window_bounds = array<i64: 1, 128>}, {transform_indices = @transform_2, window_bounds = array<i64: 1, 128>}, {transform_indices = @transform_3, window_bounds = array<i64: 32, 128>}]} {
    %c0 = arith.constant 0 : index
    %c0_0 = arith.constant 0 : index
    %0 = vector.load %arg2[%c0, %c0_0] : memref<32x128xf32, #tpu.memory_space<vmem>>, vector<32x128xf32>
    %c0_1 = arith.constant 0 : index
    %c0_2 = arith.constant 0 : index
    %1 = vector.load %arg3[%c0_1, %c0_2] : memref<1x128xf32, #tpu.memory_space<vmem>>, vector<1x128xf32>
    %2 = vector.broadcast %1 : vector<1x128xf32> to vector<32x128xf32>
    %3 = arith.mulf %0, %2 : vector<32x128xf32>
    %c0_3 = arith.constant 0 : index
    %c0_4 = arith.constant 0 : index
    %4 = vector.load %arg4[%c0_3, %c0_4] : memref<1x128xf32, #tpu.memory_space<vmem>>, vector<1x128xf32>
    %5 = vector.broadcast %4 : vector<1x128xf32> to vector<32x128xf32>
    %6 = arith.addf %3, %5 : vector<32x128xf32>
    %cst = arith.constant 0.000000e+00 : f32
    %7 = vector.broadcast %cst : f32 to vector<32x128xf32>
    %8 = arith.maximumf %6, %7 : vector<32x128xf32>
    %c0_5 = arith.constant 0 : index
    %c0_6 = arith.constant 0 : index
    %9 = vector.load %arg5[%c0_5, %c0_6] : memref<32x128xf32, #tpu.memory_space<vmem>>, vector<32x128xf32>
    tpu.vector_store %arg5[%c0_5, %c0_6], %8 {strides = array<i32>} : memref<32x128xf32, #tpu.memory_space<vmem>>, vector<32x128xf32>,
    return
  }
  func.func @transform_0(%arg0: i32, %arg1: i32) -> (i32, i32) {
    %c0_i32 = arith.constant 0 : i32
    return %arg0, %arg1 : i32, i32
  }
  func.func @transform_1(%arg0: i32, %arg1: i32) -> (i32, i32) {
    %c0_i32 = arith.constant 0 : i32
    %c0_i32_0 = arith.constant 0 : i32
    return %c0_i32, %arg1 : i32, i32
  }
  func.func @transform_2(%arg0: i32, %arg1: i32) -> (i32, i32) {
    %c0_i32 = arith.constant 0 : i32
    %c0_i32_0 = arith.constant 0 : i32
    return %c0_i32, %arg1 : i32, i32
  }
  func.func @transform_3(%arg0: i32, %arg1: i32) -> (i32, i32) {
    %c0_i32 = arith.constant 0 : i32
    return %arg0, %arg1 : i32, i32
  }
}

</mosaic_0001>

<bundles_post_ra>
// kernel: tile.18
= control target key start
LH: loop header
LB: loop body
LE: loop exit
PB: predicated region body
PF: predicated region fallthrough
CT: control target
= control target key end

     0   :  { %s28_s0 = inlined_call_operand.vmem [shape: f32[8], index: 0, kind: input, shape index: {}]   ;;  %s29_s1 = inlined_call_operand.vmem [shape: f32[16,8], index: 1, kind: output, shape index: {}]  }
   0x1   :  { %v4_v0 = vld [vmem:[%s28_s0] ss:$0 sm:$0xff] }
   0x2   :  { %5 = vst [vmem:[%s29_s1] sm:$0xff] %v4_v0  ;;  %8 = vst [vmem:[%s29_s1 + $0x8] sm:$0xff] %v4_v0 }

// kernel: tile.19
= control target key start
LH: loop header
LB: loop body
LE: loop exit
PB: predicated region body
PF: predicated region fallthrough
CT: control target
= control target key end

     0   :  { %s131_s10 = smov 120   ;;  %s132_s11 = smov 104   ;;  %vm3_vm0 = vcmask 64512   ;;  %vm9_vm1 = vcmask 1048512   ;;  %vm15_vm2 = vcmask 982912   ;;  %vm21_vm3 = vcmask 917312   ;;  %s207_s0 = inlined_call_operand.vmem [shape: f32[16,8], index: 0, kind: input, shape index: {}]   ;;  %s208_s1 = inlined_call_operand.vmem [shape: f32[1,128], index: 1, kind: output, shape index: {}]  }
   0x1   :  { %v101_v0 = vld [vmem:[%s207_s0 + $0xf] sm:$0x1]   ;;  %v103_v1 = vld [vmem:[%s207_s0 + $0xd] sm:$0x1]   ;;  %v102_v2 = vld [vmem:[%s207_s0 + $0xe] sm:$0x1]  }
   0x2   :  { %7 = vrot.lane.b32.xlu0 %v101_v0, %s131_s10  ;;  %19 = vrot.lane.b32.xlu1 %v103_v1, %s132_s11  ;;  %v104_v3 = vld [vmem:[%s207_s0 + $0xc] sm:$0x1]   ;;  %s133_s16 = smov 112   ;;  %s134_s17 = smov 96   ;;  %v105_v4 = vld [vmem:[%s207_s0 + $0xb] sm:$0x1]  }
   0x3   :  { %v106_v5 = vld [vmem:[%s207_s0 + $0xa] sm:$0x1]   ;;  %v2_v6 = vld [vmem:[%s207_s0] sm:$0x1]   ;;  %s135_s24 = smov 88   ;;  %s136_s25 = smov 80  }
   0x4   :  { %4 = vst.msk [vmem:[#allocation0] sm:$0x1] %vm3_vm0, %v2_v6   ;;  %v107_v7 = vld [vmem:[%s207_s0 + $0x9] sm:$0x1]   ;;  %v108_v8 = vld [vmem:[%s207_s0 + $0x8] sm:$0x1]  }
   0x5   :  { %s137_s30 = smov 72   ;;  %s138_s2 = smov 64   ;;  %v109_v9 = vld [vmem:[%s207_s0 + $0x7] sm:$0x1]   ;;  %v110_v10 = vld [vmem:[%s207_s0 + $0x6] sm:$0x1]  }
   0x6   :  { %13 = vrot.lane.b32.xlu0 %v102_v2, %s133_s16  ;;  %25 = vrot.lane.b32.xlu1 %v104_v3, %s134_s17  ;;  %s139_s7 = smov 56   ;;  %s140_s8 = smov 48   ;;  %v111_v11 = vld [vmem:[%s207_s0 + $0x5] sm:$0x1]   ;;  %v112_v12 = vld [vmem:[%s207_s0 + $0x4] sm:$0x1]  }
   0x7   :  { %s141_s13 = smov 40   ;;  %s142_s14 = smov 32   ;;  %v113_v13 = vld [vmem:[%s207_s0 + $0x3] sm:$0x1]   ;;  %v114_v14 = vld [vmem:[%s207_s0 + $0x2] sm:$0x1]  }
   0x8   :  { %s143_s19 = smov 24   ;;  %s144_s20 = smov 16   ;;  %v115_v15 = vld [vmem:[%s207_s0 + $0x1] sm:$0x1]   ;;  %vm27_vm4 = vcmask 851712   ;;  %vm33_vm5 = vcmask 786112  }
   0x9   :  { %s145_s0 = smov 8   ;;  %vm39_vm6 = vcmask 720512   ;;  %vm45_vm7 = vcmask 654912   ;;  %vm51_vm8 = vcmask 589312   ;;  %vm57_vm9 = vcmask 523712  }
   0xa   :  { %31 = vrot.lane.b32.xlu0 %v105_v4, %s135_s24  ;;  %37 = vrot.lane.b32.xlu1 %v106_v5, %s136_s25  ;;  %vm63_vm10 = vcmask 458112   ;;  %vm69_vm11 = vcmask 392512   ;;  %vm75_vm12 = vcmask 326912   ;;  %vm81_vm13 = vcmask 261312  }
   0xb   :  { %vm87_vm14 = vcmask 195712   ;;  %vm93_vm15 = vcmask 130112  }
   0xe   :  { %43 = vrot.lane.b32.xlu0 %v107_v7, %s137_s30  ;;  %49 = vrot.lane.b32.xlu1 %v108_v8, %s138_s2 }
  0x12   :  { %55 = vrot.lane.b32.xlu0 %v109_v9, %s139_s7  ;;  %61 = vrot.lane.b32.xlu1 %v110_v10, %s140_s8 }
  0x16   :  { %67 = vrot.lane.b32.xlu0 %v111_v11, %s141_s13  ;;  %73 = vrot.lane.b32.xlu1 %v112_v12, %s142_s14 }
  0x1a   :  { %79 = vrot.lane.b32.xlu0 %v113_v13, %s143_s19  ;;  %85 = vrot.lane.b32.xlu1 %v114_v14, %s144_s20 }
  0x1e   :  { %91 = vrot.lane.b32.xlu0 %v115_v15, %s145_s0 }
  0x74   :  { %v8_v16 = vpop.permute.xlu0 %7   ;;  %v20_v17 = vpop.permute.xlu1 %19  }
  0x75   :  { %10 = vst.msk [vmem:[#allocation0] sm:$0x1] %vm9_vm1, %v8_v16  }
  0x78   :  { %v14_v18 = vpop.permute.xlu0 %13   ;;  %v26_v19 = vpop.permute.xlu1 %25  }
  0x79   :  { %16 = vst.msk [vmem:[#allocation0] sm:$0x1] %vm15_vm2, %v14_v18  }
  0x7a   :  { %22 = vst.msk [vmem:[#allocation0] sm:$0x1] %vm21_vm3, %v20_v17  }
  0x7b   :  { %28 = vst.msk [vmem:[#allocation0] sm:$0x1] %vm27_vm4, %v26_v19  }
  0x7c   :  { %v32_v20 = vpop.permute.xlu0 %31   ;;  %v38_v21 = vpop.permute.xlu1 %37  }
  0x7d   :  { %34 = vst.msk [vmem:[#allocation0] sm:$0x1] %vm33_vm5, %v32_v20  }
  0x7e   :  { %40 = vst.msk [vmem:[#allocation0] sm:$0x1] %vm39_vm6, %v38_v21  }
  0x80   :  { %v44_v22 = vpop.permute.xlu0 %43   ;;  %v50_v23 = vpop.permute.xlu1 %49  }
  0x81   :  { %46 = vst.msk [vmem:[#allocation0] sm:$0x1] %vm45_vm7, %v44_v22  }
  0x82   :  { %52 = vst.msk [vmem:[#allocation0] sm:$0x1] %vm51_vm8, %v50_v23  }
  0x84   :  { %v56_v24 = vpop.permute.xlu0 %55   ;;  %v62_v25 = vpop.permute.xlu1 %61  }
  0x85   :  { %58 = vst.msk [vmem:[#allocation0] sm:$0x1] %vm57_vm9, %v56_v24  }
  0x86   :  { %64 = vst.msk [vmem:[#allocation0] sm:$0x1] %vm63_vm10, %v62_v25  }
  0x88   :  { %v68_v26 = vpop.permute.xlu0 %67   ;;  %v74_v27 = vpop.permute.xlu1 %73  }
  0x89   :  { %70 = vst.msk [vmem:[#allocation0] sm:$0x1] %vm69_vm11, %v68_v26  }
  0x8a   :  { %76 = vst.msk [vmem:[#allocation0] sm:$0x1] %vm75_vm12, %v74_v27  }
  0x8c   :  { %v80_v28 = vpop.permute.xlu0 %79   ;;  %v86_v29 = vpop.permute.xlu1 %85  }
  0x8d   :  { %82 = vst.msk [vmem:[#allocation0] sm:$0x1] %vm81_vm13, %v80_v28  }
  0x8e   :  { %88 = vst.msk [vmem:[#allocation0] sm:$0x1] %vm87_vm14, %v86_v29  }
  0x90   :  { %v92_v30 = vpop.permute.xlu0 %91  }
  0x91   :  { %94 = vst.msk [vmem:[#allocation0] sm:$0x1] %vm93_vm15, %v92_v30  }
  0x98   :  { %v98_v31 = vld [vmem:[#allocation0] sm:$0x1] }
  0x99   :  { %100 = vst [vmem:[%s208_s1] sm:$0x1] %v98_v31 }

// kernel: conv_block_forward.2
= control target key start
LH: loop header
LB: loop body
LE: loop exit
PB: predicated region body
PF: predicated region fallthrough
CT: control target
= control target key end

     0   :  { %v261_v0 = vmov 0.0|0.0   ;;  %vm48_vm0 = vcmask 719872   ;;  %v262_v42 = vmov 0.0   ;;  %vm177_vm1 = vcmask 1040384   ;;  %s433_s1 = inlined_call_operand.vmem [shape: f32[216,128], index: 1, kind: input, shape index: {}]   ;;  %s434_s0 = inlined_call_operand.vmem [shape: f32[32,216], index: 0, kind: input, shape index: {}]   ;;  %s435_s2 = inlined_call_operand.vmem [shape: f32[32,128], index: 2, kind: output, shape index: {0}]   ;;  %s436_s3 = inlined_call_operand.vmem [shape: f32[1,2,128], index: 3, kind: output, shape index: {1}]  }
   0x1   :  { %192 = vmatprep.subr.bf16.mxu0 %v261_v0  ;;  %v21_v1 = vld [vmem:[%s433_s1] sm:$0xff]  ;;  %v22_v2 = vld [vmem:[%s433_s1 + $0x8] sm:$0xff]  ;;  %231 = vmatprep.subr.bf16.mxu1 %v261_v0  ;;  %v23_v3 = vld [vmem:[%s433_s1 + $0x10] sm:$0xff] }
   0x2   :  { %v193_v4 = vpack.c.bf16 %v22_v2, %v21_v1  ;;  %v24_v5 = vld [vmem:[%s433_s1 + $0x18] sm:$0xff]  ;;  %v25_v7 = vld [vmem:[%s433_s1 + $0x20] sm:$0xff]  ;;  %v26_v8 = vld [vmem:[%s433_s1 + $0x28] sm:$0xff] }
   0x3   :  { %v196_v6 = vpack.c.bf16 %v24_v5, %v23_v3  ;;  %v199_v9 = vpack.c.bf16 %v26_v8, %v25_v7  ;;  %v27_v10 = vld [vmem:[%s433_s1 + $0x30] sm:$0xff]  ;;  %v28_v11 = vld [vmem:[%s433_s1 + $0x38] sm:$0xff]  ;;  %v14_v12 = vld [vmem:[%s434_s0 + $0x8] sm:$0xff] }
   0x4   :  { %194 = vmatpush1.bf16.msra.mxu0 %v193_v4  ;;  %245 = vmatpush1.bf16.msra.mxu1 %v193_v4  ;;  %v18_v13 = vld [vmem:[%s434_s0 + $0x28] sm:$0xff]  ;;  %v202_v14 = vpack.c.bf16 %v28_v11, %v27_v10  ;;  %v29_v15 = vld [vmem:[%s433_s1 + $0x40] sm:$0xff]  ;;  %v31_v18 = vld [vmem:[%s433_s1 + $0x50] sm:$0xff] }
   0x5   :  { %195 = vmatprep.subr.bf16.mxu0 %v261_v0  ;;  %232 = vmatprep.subr.bf16.mxu1 %v261_v0  ;;  %v30_v16 = vld [vmem:[%s433_s1 + $0x48] sm:$0xff]  ;;  %v32_v19 = vld [vmem:[%s433_s1 + $0x58] sm:$0xff]  ;;  %v33_v21 = vld [vmem:[%s433_s1 + $0x60] sm:$0xff] }
   0x6   :  { %188 = vmatprep.mubr.msk.f32.mxu0 %vm48_vm0, %v14_v12  ;;  %190 = vmatprep.mubr.msk.f32.mxu1 %vm48_vm0, %v18_v13  ;;  %v205_v17 = vpack.c.bf16 %v30_v16, %v29_v15  ;;  %v208_v20 = vpack.c.bf16 %v32_v19, %v31_v18  ;;  %v34_v22 = vld [vmem:[%s433_s1 + $0x68] sm:$0xff]  ;;  %v35_v24 = vld [vmem:[%s433_s1 + $0x70] sm:$0xff]  ;;  %v36_v25 = vld [vmem:[%s433_s1 + $0x78] sm:$0xff] }
   0x7   :  { %v211_v23 = vpack.c.bf16 %v34_v22, %v33_v21  ;;  %v214_v26 = vpack.c.bf16 %v36_v25, %v35_v24  ;;  %v37_v27 = vld [vmem:[%s433_s1 + $0x80] sm:$0xff]  ;;  %v38_v28 = vld [vmem:[%s433_s1 + $0x88] sm:$0xff]  ;;  %v39_v30 = vld [vmem:[%s433_s1 + $0x90] sm:$0xff] }
   0x8   :  { %197 = vmatpush1.bf16.msra.mxu0 %v196_v6  ;;  %246 = vmatpush1.bf16.msra.mxu1 %v196_v6  ;;  %v217_v29 = vpack.c.bf16 %v38_v28, %v37_v27  ;;  %v40_v31 = vld [vmem:[%s433_s1 + $0x98] sm:$0xff]  ;;  %v41_v33 = vld [vmem:[%s433_s1 + $0xa0] sm:$0xff]  ;;  %v42_v34 = vld [vmem:[%s433_s1 + $0xa8] sm:$0xff] }
   0x9   :  { %198 = vmatprep.subr.bf16.mxu0 %v261_v0  ;;  %233 = vmatprep.subr.bf16.mxu1 %v261_v0  ;;  %v220_v32 = vpack.c.bf16 %v40_v31, %v39_v30  ;;  %v223_v35 = vpack.c.bf16 %v42_v34, %v41_v33  ;;  %v43_v36 = vld [vmem:[%s433_s1 + $0xb0] sm:$0xff]  ;;  %v44_v37 = vld [vmem:[%s433_s1 + $0xb8] sm:$0xff]  ;;  %v45_v39 = vld [vmem:[%s433_s1 + $0xc0] sm:$0xff] }
   0xa   :  { %v226_v38 = vpack.c.bf16 %v44_v37, %v43_v36  ;;  %v46_v40 = vld [vmem:[%s433_s1 + $0xc8] sm:$0xff]  ;;  %v47_v43 = vld [vmem:[%s433_s1 + $0xd0] sm:$0xff]  ;;  %v13_v44 = vld [vmem:[%s434_s0] sm:$0xff] }
   0xb   :  { %v229_v41 = vpack.c.bf16 %v46_v40, %v45_v39  ;;  %v17_v45 = vld [vmem:[%s434_s0 + $0x20] sm:$0xff]  ;;  %v16_v46 = vld [vmem:[%s434_s0 + $0x18] sm:$0xff]  ;;  %v15_v48 = vld [vmem:[%s434_s0 + $0x10] sm:$0xff] }
   0xc   :  { %200 = vmatpush1.bf16.msra.mxu0 %v199_v9  ;;  %247 = vmatpush1.bf16.msra.mxu1 %v199_v9  ;;  %v20_v47 = vld [vmem:[%s434_s0 + $0x38] sm:$0xff]  ;;  %v19_v49 = vld [vmem:[%s434_s0 + $0x30] sm:$0xff] }
   0xd   :  { %201 = vmatprep.subr.bf16.mxu0 %v261_v0  ;;  %234 = vmatprep.subr.bf16.mxu1 %v261_v0 }
  0x10   :  { %203 = vmatpush1.bf16.msra.mxu0 %v202_v14  ;;  %248 = vmatpush1.bf16.msra.mxu1 %v202_v14 }
  0x11   :  { %204 = vmatprep.subr.bf16.mxu0 %v261_v0  ;;  %235 = vmatprep.subr.bf16.mxu1 %v261_v0 }
  0x14   :  { %206 = vmatpush1.bf16.msra.mxu0 %v205_v17  ;;  %249 = vmatpush1.bf16.msra.mxu1 %v205_v17 }
  0x15   :  { %207 = vmatprep.subr.bf16.mxu0 %v261_v0  ;;  %236 = vmatprep.subr.bf16.mxu1 %v261_v0 }
  0x18   :  { %209 = vmatpush1.bf16.msra.mxu0 %v208_v20  ;;  %250 = vmatpush1.bf16.msra.mxu1 %v208_v20 }
  0x19   :  { %210 = vmatprep.subr.bf16.mxu0 %v261_v0  ;;  %237 = vmatprep.subr.bf16.mxu1 %v261_v0 }
  0x1c   :  { %212 = vmatpush1.bf16.msra.mxu0 %v211_v23  ;;  %251 = vmatpush1.bf16.msra.mxu1 %v211_v23 }
  0x1d   :  { %213 = vmatprep.subr.bf16.mxu0 %v261_v0  ;;  %238 = vmatprep.subr.bf16.mxu1 %v261_v0 }
  0x20   :  { %215 = vmatpush1.bf16.msra.mxu0 %v214_v26  ;;  %252 = vmatpush1.bf16.msra.mxu1 %v214_v26 }
  0x21   :  { %216 = vmatprep.subr.bf16.mxu0 %v261_v0  ;;  %239 = vmatprep.subr.bf16.mxu1 %v261_v0 }
  0x24   :  { %218 = vmatpush1.bf16.msra.mxu0 %v217_v29  ;;  %253 = vmatpush1.bf16.msra.mxu1 %v217_v29 }
  0x25   :  { %219 = vmatprep.subr.bf16.mxu0 %v261_v0  ;;  %240 = vmatprep.subr.bf16.mxu1 %v261_v0 }
  0x28   :  { %221 = vmatpush1.bf16.msra.mxu0 %v220_v32  ;;  %254 = vmatpush1.bf16.msra.mxu1 %v220_v32 }
  0x29   :  { %222 = vmatprep.subr.bf16.mxu0 %v261_v0  ;;  %241 = vmatprep.subr.bf16.mxu1 %v261_v0 }
  0x2c   :  { %224 = vmatpush1.bf16.msra.mxu0 %v223_v35  ;;  %255 = vmatpush1.bf16.msra.mxu1 %v223_v35 }
  0x2d   :  { %225 = vmatprep.subr.bf16.mxu0 %v261_v0  ;;  %242 = vmatprep.subr.bf16.mxu1 %v261_v0 }
  0x30   :  { %227 = vmatpush1.bf16.msra.mxu0 %v226_v38  ;;  %256 = vmatpush1.bf16.msra.mxu1 %v226_v38 }
  0x31   :  { %228 = vmatprep.subr.bf16.mxu0 %v261_v0  ;;  %243 = vmatprep.subr.bf16.mxu1 %v261_v0 }
  0x34   :  { %230 = vmatpush1.bf16.msra.mxu0 %v229_v41  ;;  %257 = vmatpush1.bf16.msra.mxu1 %v229_v41 }
  0x35   :  { %113 = vmatprep.subr.mxu0 %v262_v42  ;;  %244 = vmatprep.subr.mxu1 %v262_v42 }
  0x38   :  { %114 = vmatpush1.msra.mxu0 %v47_v43  ;;  %258 = vmatpush1.msra.mxu1 %v47_v43 }
  0x39   :  { %126 = vmatmul.mubr.f32.vlgmr.msra.gmra.mrb[0].mxu0 %v13_v44  ;;  %136 = vmatmul.mubr.f32.vlgmr.msra.gmra.mrb[0].mxu1 %v17_v45 }
  0x3a   :  { %189 = vmatprep.mubr.msk.f32.mxu0 %vm48_vm0, %v16_v46  ;;  %191 = vmatprep.mubr.msk.f32.mxu1 %vm48_vm0, %v20_v47 }
  0x3d   :  { %131 = vmatmul.mubr.f32.gmra.mrb[2].mxu0 %v15_v48  ;;  %141 = vmatmul.mubr.f32.gmra.mrb[2].mxu1 %v19_v49 }
 0x10c   :  { %v127_v50 = vpop.f32.mrb[0].mxu0  ;;  %v137_v51 = vpop.f32.mrb[0].mxu1 }
 0x10d   :  { %146 = vst [vmem:[%s435_s2] sm:$0xff] %v127_v50  ;;  %v129_v52 = vpop.f32.mrb[1].mxu0  ;;  %148 = vst [vmem:[%s435_s2 + $0x10] sm:$0xff] %v137_v51  ;;  %v139_v53 = vpop.f32.mrb[1].mxu1 }
 0x110   :  { %v132_v54 = vpop.f32.mrb[2].mxu0  ;;  %v142_v55 = vpop.f32.mrb[2].mxu1 }
 0x111   :  { %147 = vst [vmem:[%s435_s2 + $0x8] sm:$0xff] %v132_v54  ;;  %v150_v56 = vadd.f32 %v132_v54, %v127_v50  ;;  %v134_v57 = vpop.f32.mrb[3].mxu0  ;;  %149 = vst [vmem:[%s435_s2 + $0x18] sm:$0xff] %v142_v55  ;;  %v144_v58 = vpop.f32.mrb[3].mxu1 }
 0x113   :  { %v151_v59 = vadd.f32 %v150_v56, %v137_v51 }
 0x115   :  { %v152_v60 = vadd.f32 %v151_v59, %v142_v55 }
 0x117   :  { %v153_v61 = vrot.slane %v152_v60, 4 }
 0x119   :  { %v154_v62 = vadd.f32 %v153_v61, %v152_v60 }
 0x11b   :  { %v155_v63 = vrot.slane %v154_v62, 2 }
 0x11d   :  { %v156_v0 = vadd.f32 %v155_v63, %v154_v62 }
 0x11f   :  { %v157_v1 = vrot.slane %v156_v0, 1 }
 0x121   :  { %v158_v2 = vadd.f32 %v157_v1, %v156_v0 }
 0x123   :  { %v159_v3 = vmul.f32 0.03125, %v158_v2 }
 0x125   :  { %v160_v4 = vsub.f32 %v127_v50, %v159_v3  ;;  %v161_v5 = vsub.f32 %v132_v54, %v159_v3  ;;  %v162_v6 = vsub.f32 %v137_v51, %v159_v3  ;;  %v163_v7 = vsub.f32 %v142_v55, %v159_v3 }
 0x127   :  { %v164_v8 = vmul.f32 %v160_v4, %v160_v4  ;;  %v165_v9 = vmul.f32 %v161_v5, %v161_v5  ;;  %v166_v10 = vmul.f32 %v162_v6, %v162_v6  ;;  %v167_v12 = vmul.f32 %v163_v7, %v163_v7 }
 0x129   :  { %v168_v11 = vadd.f32 %v165_v9, %v164_v8 }
 0x12b   :  { %v169_v13 = vadd.f32 %v168_v11, %v166_v10 }
 0x12d   :  { %v170_v14 = vadd.f32 %v169_v13, %v167_v12 }
 0x12f   :  { %v171_v15 = vrot.slane %v170_v14, 4 }
 0x131   :  { %v172_v16 = vadd.f32 %v171_v15, %v170_v14 }
 0x133   :  { %v173_v17 = vrot.slane %v172_v16, 2 }
 0x135   :  { %v174_v18 = vadd.f32 %v173_v17, %v172_v16 }
 0x137   :  { %v175_v19 = vrot.slane %v174_v18, 1 }
 0x139   :  { %v176_v20 = vadd.f32 %v175_v19, %v174_v18 }
 0x13b   :  { %v178_v21 = vsel %vm177_vm1, %v158_v2, %v176_v20 }
 0x13c   :  { %179 = vst [vmem:[%s436_s3] sm:$0x3] %v178_v21 }

// kernel: conv_block_forward.3
= control target key start
LH: loop header
LB: loop body
LE: loop exit
PB: predicated region body
PF: predicated region fallthrough
CT: control target
= control target key end

     0   :  { %s104_s0 = inlined_call_operand.vmem [shape: f32[32,128], index: 0, kind: input, shape index: {}]   ;;  %s105_s1 = inlined_call_operand.vmem [shape: f32[1,128], index: 1, kind: input, shape index: {}]   ;;  %s106_s2 = inlined_call_operand.vmem [shape: f32[1,128], index: 2, kind: input, shape index: {}]   ;;  %s107_s3 = inlined_call_operand.vmem [shape: f32[32,128], index: 3, kind: output, shape index: {}]  }
   0x1   :  { %v14_v0 = vld [vmem:[%s104_s0] sm:$0xff]  ;;  %v15_v4 = vld [vmem:[%s104_s0 + $0x8] sm:$0xff]  ;;  %v16_v5 = vld [vmem:[%s104_s0 + $0x10] sm:$0xff] }
   0x2   :  { %v52_v1 = vld [vmem:[%s105_s1] ss:$0 sm:$0xff]  ;;  %v17_v6 = vld [vmem:[%s104_s0 + $0x18] sm:$0xff] }
   0x3   :  { %v53_v2 = vld [vmem:[%s106_s2] ss:$0 sm:$0xff]  ;;  %v25_v3 = vmul.f32 %v52_v1, %v14_v0  ;;  %v26_v7 = vmul.f32 %v52_v1, %v15_v4  ;;  %v27_v8 = vmul.f32 %v52_v1, %v16_v5  ;;  %v28_v9 = vmul.f32 %v52_v1, %v17_v6 }
   0x5   :  { %v36_v10 = vadd.f32 %v53_v2, %v25_v3  ;;  %v37_v11 = vadd.f32 %v53_v2, %v26_v7  ;;  %v38_v12 = vadd.f32 %v53_v2, %v27_v8  ;;  %v39_v13 = vadd.f32 %v53_v2, %v28_v9 }
   0x7   :  { %v40_v14 = vmax.f32 %v36_v10, 0.0  ;;  %v41_v15 = vmax.f32 %v37_v11, 0.0  ;;  %v42_v16 = vmax.f32 %v38_v12, 0.0  ;;  %v43_v17 = vmax.f32 %v39_v13, 0.0 }
   0x9   :  { %44 = vst [vmem:[%s107_s3] sm:$0xff] %v40_v14  ;;  %45 = vst [vmem:[%s107_s3 + $0x8] sm:$0xff] %v41_v15 }
   0xa   :  { %46 = vst [vmem:[%s107_s3 + $0x10] sm:$0xff] %v42_v16  ;;  %47 = vst [vmem:[%s107_s3 + $0x18] sm:$0xff] %v43_v17 }

</bundles_post_ra>
